<compile_context>
chip_gen: v6e
topology: v6e:2x2x1
jax: 0.10.0
libtpu: 0.0.40
codegen_flags: <defaults>
</compile_context>

<pallas_src>
import math
from functools import partial

import jax
import jax.numpy as jnp
from jax.experimental import pallas as pl
from jax.experimental.pallas import tpu as pltpu


def _round_up(x, m):
    return ((x + m - 1) // m) * m


def policy_kernel(x_ref, w1_ref, w2_ref, out_ref):
    """One batch tile of the fused forward pass.

    x_ref   : (TB, K_pad) bf16   [canv_target | canv_arg | op_onehot | 1 | 0-pad]
    w1_ref  : (K_pad, HP) bf16   fused layer_1|layer_V (+ folded biases, +1-lane)
    w2_ref  : (HP, OUT_W) f32    fused mu|sigma|V head (+ folded biases, -5 shift)
    out_ref : (TB, OUT_W) f32    [mu | sigma | V in lane 2*N_flat | 0-pad]
    """
    f32 = jnp.float32
    out_w = out_ref.shape[-1]
    n_flat = (out_w - 128) // 2            # mu lanes [0,n_flat), sigma [n_flat,2n_flat)

    # Fused layer_1 | layer_V: relu(x @ [W1|WV] + [b1|bV]); biases enter via the
    # constant-1 input lane, and one hidden lane is wired to relu(1) == 1 so the
    # head biases can be folded into w2 as well.
    h = jnp.maximum(
        jnp.dot(x_ref[...], w1_ref[...], preferred_element_type=f32), 0.0)

    # Fused mu | sigma | V head (f32 weights; all biases + sigma's -5 folded in).
    z = jnp.dot(h, w2_ref[...], preferred_element_type=f32)

    lane = jax.lax.broadcasted_iota(jnp.int32, z.shape, dimension=1)
    eps = 0.01
    sig = jax.nn.sigmoid(z)
    head = jnp.where(lane < n_flat, eps + (1.0 - 2.0 * eps) * sig, sig)
    # V lane (and zero padding lanes) pass through untransformed.
    out_ref[...] = jnp.where(lane < 2 * n_flat, head, z)


def make_params(key, N_side, N_ops, N_hidden):
    """Unfused, f32, PyTorch-Linear-style init (uniform +/- 1/sqrt(fan_in)).
    Weights are already transposed to (in_features, out_features)."""
    N_flat = N_side * N_side
    N_inputs = 2 * N_flat + N_ops

    def linear(key, fan_in, fan_out):
        kw, kb = jax.random.split(key)
        bound = 1.0 / math.sqrt(fan_in)
        w = jax.random.uniform(kw, (fan_in, fan_out), jnp.float32, -bound, bound)
        b = jax.random.uniform(kb, (1, fan_out), jnp.float32, -bound, bound)
        return w, b

    keys = jax.random.split(key, 5)
    w1, b1 = linear(keys[0], N_inputs, N_hidden)       # layer_1
    wv, bv = linear(keys[1], N_inputs, N_hidden)       # layer_V
    wmu, bmu = linear(keys[2], N_hidden, N_flat)       # canv_out_2_mu
    wsig, bsig = linear(keys[3], N_hidden, N_flat)     # canv_out_2_sigma
    wvo, bvo = linear(keys[4], N_hidden, 1)            # V_canv_2
    return (w1, b1, wv, bv, wmu, bmu, wsig, bsig, wvo, bvo)


def fuse_params(raw, N_side, N_ops, N_hidden):
    """Pack all weights/biases into two kernel operands (done once, not per call)."""
    (w1, b1, wv, bv, wmu, bmu, wsig, bsig, wvo, bvo) = raw
    N_flat = N_side * N_side
    H = N_hidden
    k_raw = 2 * N_flat + N_ops            # real input features
    k_pad = _round_up(k_raw + 1, 128)     # + constant-1 lane, lane-aligned
    hp = _round_up(2 * H + 1, 128)        # padded hidden width incl. bias lane
    out_w = 2 * N_flat + 128              # [mu | sigma | V-in-lane-0-of-last-128]
    bias_row = k_raw                      # input position holding the constant 1
    bias_lane = 2 * H                     # hidden lane forced to 1

    # Fused layer_1 | layer_V (bf16 for the MXU; biases folded via bias_row).
    w1p = jnp.zeros((k_pad, hp), jnp.float32)
    w1p = w1p.at[:k_raw, 0:H].set(w1)
    w1p = w1p.at[:k_raw, H:2 * H].set(wv)
    w1p = w1p.at[bias_row, 0:H].set(b1[0])
    w1p = w1p.at[bias_row, H:2 * H].set(bv[0])
    w1p = w1p.at[bias_row, bias_lane].set(1.0)   # -> h[:, bias_lane] == relu(1) == 1
    w1p = w1p.astype(jnp.bfloat16)

    # Fused mu | sigma | V head, kept in f32 (accuracy). Value-hidden rows feed
    # only the V lane; policy-hidden rows feed only mu/sigma; biases (and the
    # sigma -5 shift) live in the bias_lane row.
    w2p = jnp.zeros((hp, out_w), jnp.float32)
    w2p = w2p.at[0:H, 0:N_flat].set(wmu)
    w2p = w2p.at[0:H, N_flat:2 * N_flat].set(wsig)
    w2p = w2p.at[H:2 * H, 2 * N_flat].set(wvo[:, 0])
    w2p = w2p.at[bias_lane, 0:N_flat].set(bmu[0])
    w2p = w2p.at[bias_lane, N_flat:2 * N_flat].set(bsig[0] - 5.0)
    w2p = w2p.at[bias_lane, 2 * N_flat].set(bvo[0, 0])
    return (w1p, w2p)


@partial(jax.jit, static_argnums=(4,))
def policy_nn_canvas_2_forward_batched(canv_target, canv_arg, op_OHE,
                                       fused_params, N_side):
    """Batched forward: canv_target/canv_arg (B, N_side, N_side), op_OHE (B, N_ops)."""
    w1p, w2p = fused_params
    N_flat = N_side * N_side
    K_pad, HP = w1p.shape
    OUT_W = w2p.shape[1]
    B = canv_target.shape[0]

    ct = canv_target.reshape(B, N_flat).astype(jnp.float32)
    ca = canv_arg.reshape(B, N_flat).astype(jnp.float32)
    op = op_OHE.reshape(B, -1).astype(jnp.float32)
    k_raw = 2 * N_flat + op.shape[1]
    x = jnp.concatenate(
        [ct, ca, op,
         jnp.ones((B, 1), jnp.float32),
         jnp.zeros((B, K_pad - k_raw - 1), jnp.float32)],
        axis=-1).astype(jnp.bfloat16)

    # Batch tiling: one resident block for small B; 128-row tiles for big B
    # ("parallel" grid -> sharded across the 2 TensorCores on v7x).
    if B <= 8:
        TB = BP = B
    elif B <= 128:
        TB = BP = _round_up(B, 8)
    else:
        TB = 128
        BP = _round_up(B, 128)
    if BP != B:
        x = jnp.concatenate([x, jnp.zeros((BP - B, K_pad), x.dtype)], axis=0)

    out = pl.pallas_call(
        policy_kernel,
        out_shape=jax.ShapeDtypeStruct((BP, OUT_W), jnp.float32),
        grid=(BP // TB,),
        in_specs=[
            pl.BlockSpec((TB, K_pad), lambda i: (i, 0)),
            pl.BlockSpec((K_pad, HP), lambda i: (0, 0)),   # weights VMEM-resident
            pl.BlockSpec((HP, OUT_W), lambda i: (0, 0)),   # weights VMEM-resident
        ],
        out_specs=pl.BlockSpec((TB, OUT_W), lambda i: (i, 0)),
        compiler_params=pltpu.CompilerParams(dimension_semantics=("parallel",)),
    )(x, w1p, w2p)

    return {
        'canv_2_mu': out[:B, :N_flat].reshape(B, N_side, N_side),
        'canv_2_sigma': out[:B, N_flat:2 * N_flat].reshape(B, N_side, N_side),
        'V_canv_2': out[:B, 2 * N_flat:2 * N_flat + 1],
    }


@partial(jax.jit, static_argnums=(4,))
def policy_nn_canvas_2_forward(canv_target, canv_arg, op_OHE, fused_params, N_side):
    """Single-sample forward matching the PyTorch module's signature/semantics."""
    out = policy_nn_canvas_2_forward_batched(
        canv_target.reshape(1, N_side, N_side),
        canv_arg.reshape(1, N_side, N_side),
        op_OHE.reshape(1, -1),
        fused_params, N_side)
    return {'canv_2_mu': out['canv_2_mu'][0],
            'canv_2_sigma': out['canv_2_sigma'][0],
            'V_canv_2': out['V_canv_2']}          # (1, 1), as in the PyTorch module


def reference_forward_batched(ct, ca, op, raw, N_side):
    """Pure-JAX f32 reference mirroring the PyTorch module (batched)."""
    N_flat = N_side * N_side
    (w1, b1, wv, bv, wmu, bmu, wsig, bsig, wvo, bvo) = raw
    B = ct.shape[0]
    x = jnp.concatenate([ct.reshape(B, N_flat), ca.reshape(B, N_flat),
                         op.reshape(B, -1)], axis=1)
    h = jnp.maximum(x @ w1 + b1, 0.0)
    hv = jnp.maximum(x @ wv + bv, 0.0)
    eps = 0.01
    mu = eps + (1.0 - 2.0 * eps) * jax.nn.sigmoid(h @ wmu + bmu)
    sig = jax.nn.sigmoid(h @ wsig + bsig - 5.0)
    v = hv @ wvo + bvo
    return {'canv_2_mu': mu.reshape(B, N_side, N_side),
            'canv_2_sigma': sig.reshape(B, N_side, N_side),
            'V_canv_2': v}


def _check(name, got, want, atol=2e-2):
    err = float(jnp.max(jnp.abs(got - want)))
    assert got.shape == want.shape, (name, got.shape, want.shape)
    assert err < atol, f"{name}: max abs err {err}"


if __name__ == "__main__":
    N_side = 16       # canvas 16x16 -> N_flat = 256
    N_ops = 8
    N_hidden = 32

    key = jax.random.PRNGKey(0)
    k_params, k_t, k_a, k_op, k_bt, k_ba, k_bop = jax.random.split(key, 7)

    raw_params = make_params(k_params, N_side, N_ops, N_hidden)
    fused_params = fuse_params(raw_params, N_side, N_ops, N_hidden)

    # ---- single-sample forward (matches the PyTorch module's forward) ----
    canv_target = jax.random.uniform(k_t, (N_side, N_side), jnp.float32)
    canv_arg = jax.random.uniform(k_a, (N_side, N_side), jnp.float32)
    op_idx = jax.random.randint(k_op, (), 0, N_ops)
    op_OHE = jax.nn.one_hot(op_idx, N_ops, dtype=jnp.float32)

    out1 = policy_nn_canvas_2_forward(canv_target, canv_arg, op_OHE,
                                      fused_params, N_side)
    jax.block_until_ready(out1)

    ref1 = reference_forward_batched(canv_target[None], canv_arg[None],
                                     op_OHE[None], raw_params, N_side)
    _check('mu(single)', out1['canv_2_mu'], ref1['canv_2_mu'][0])
    _check('sigma(single)', out1['canv_2_sigma'], ref1['canv_2_sigma'][0])
    _check('V(single)', out1['V_canv_2'], ref1['V_canv_2'])

    # ---- small batched forward (single resident block) ----
    B = 8
    bt = jax.random.uniform(k_bt, (B, N_side, N_side), jnp.float32)
    ba = jax.random.uniform(k_ba, (B, N_side, N_side), jnp.float32)
    bidx = jax.random.randint(k_bop, (B,), 0, N_ops)
    bop = jax.nn.one_hot(bidx, N_ops, dtype=jnp.float32)

    outb = policy_nn_canvas_2_forward_batched(bt, ba, bop, fused_params, N_side)
    jax.block_until_ready(outb)
    refb = reference_forward_batched(bt, ba, bop, raw_params, N_side)
    _check('mu(batch8)', outb['canv_2_mu'], refb['canv_2_mu'])
    _check('sigma(batch8)', outb['canv_2_sigma'], refb['canv_2_sigma'])
    _check('V(batch8)', outb['V_canv_2'], refb['V_canv_2'])

    # ---- larger batch exercising grid > 1 (resident weights + row padding) ----
    B2 = 160
    k2t, k2a, k2o = jax.random.split(jax.random.PRNGKey(1), 3)
    bt2 = jax.random.uniform(k2t, (B2, N_side, N_side), jnp.float32)
    ba2 = jax.random.uniform(k2a, (B2, N_side, N_side), jnp.float32)
    bop2 = jax.nn.one_hot(jax.random.randint(k2o, (B2,), 0, N_ops), N_ops,
                          dtype=jnp.float32)
    outb2 = policy_nn_canvas_2_forward_batched(bt2, ba2, bop2, fused_params, N_side)
    jax.block_until_ready(outb2)
    refb2 = reference_forward_batched(bt2, ba2, bop2, raw_params, N_side)
    _check('mu(batch160)', outb2['canv_2_mu'], refb2['canv_2_mu'])
    _check('sigma(batch160)', outb2['canv_2_sigma'], refb2['canv_2_sigma'])
    _check('V(batch160)', outb2['V_canv_2'], refb2['V_canv_2'])

    print("KERNEL_OK")
</pallas_src>

<mosaic_0001>
module attributes {stable_mosaic.version = 11 : i64} {
  func.func @policy_kernel(%arg0: i32, %arg1: memref<1x640xbf16, #tpu.memory_space<vmem>>, %arg2: memref<640x128xbf16, #tpu.memory_space<vmem>>, %arg3: memref<128x640xf32, #tpu.memory_space<vmem>>, %arg4: memref<1x640xf32, #tpu.memory_space<vmem>>) attributes {dimension_semantics = [#tpu.dimension_semantics<parallel>], iteration_bounds = array<i64: 1>, scalar_prefetch = 0 : i64, scratch_operands = 0 : i64, tpu.core_type = #tpu.core_type<tc>, window_params = [{transform_indices = @transform_0, window_bounds = array<i64: 1, 640>}, {pipeline_mode = #tpu.pipeline_mode<synchronous>, transform_indices = @transform_1, window_bounds = array<i64: 640, 128>}, {pipeline_mode = #tpu.pipeline_mode<synchronous>, transform_indices = @transform_2, window_bounds = array<i64: 128, 640>}, {transform_indices = @transform_3, window_bounds = array<i64: 1, 640>}]} {
    %c0 = arith.constant 0 : index
    %c0_0 = arith.constant 0 : index
    %0 = vector.load %arg1[%c0, %c0_0] : memref<1x640xbf16, #tpu.memory_space<vmem>>, vector<1x640xbf16>
    %c0_1 = arith.constant 0 : index
    %c0_2 = arith.constant 0 : index
    %1 = vector.load %arg2[%c0_1, %c0_2] : memref<640x128xbf16, #tpu.memory_space<vmem>>, vector<640x128xbf16>
    %cst = arith.constant dense<0.000000e+00> : vector<1x128xf32>
    %2 = tpu.matmul %0, %1, %cst {dimension_numbers = #tpu.dot_dimension_numbers<[1], [0], [0], [1], [0, 0, 1, 1], [], []>} : vector<1x640xbf16>, vector<640x128xbf16>, vector<1x128xf32> -> vector<1x128xf32>
    %cst_3 = arith.constant 0.000000e+00 : f32
    %3 = vector.broadcast %cst_3 : f32 to vector<1x128xf32>
    %4 = arith.maximumf %2, %3 : vector<1x128xf32>
    %c0_4 = arith.constant 0 : index
    %c0_5 = arith.constant 0 : index
    %5 = vector.load %arg3[%c0_4, %c0_5] : memref<128x640xf32, #tpu.memory_space<vmem>>, vector<128x640xf32>
    %cst_6 = arith.constant dense<0.000000e+00> : vector<1x640xf32>
    %6 = tpu.matmul %4, %5, %cst_6 {dimension_numbers = #tpu.dot_dimension_numbers<[1], [0], [0], [1], [0, 0, 1, 1], [], []>} : vector<1x128xf32>, vector<128x640xf32>, vector<1x640xf32> -> vector<1x640xf32>
    %7 = tpu.iota {dimensions = array<i32: 1>} : vector<1x640xi32>
    %8 = arith.negf %6 : vector<1x640xf32>
    %9 = math.exp %8 : vector<1x640xf32>
    %cst_7 = arith.constant 1.000000e+00 : f32
    %10 = vector.broadcast %cst_7 : f32 to vector<1x640xf32>
    %11 = arith.addf %10, %9 : vector<1x640xf32>
    %12 = arith.divf %10, %11 : vector<1x640xf32>
    %c256_i32 = arith.constant 256 : i32
    %13 = vector.broadcast %c256_i32 : i32 to vector<1x640xi32>
    %14 = arith.cmpi slt, %7, %13 : vector<1x640xi32>
    %cst_8 = arith.constant 9.800000e-01 : f32
    %15 = vector.broadcast %cst_8 : f32 to vector<1x640xf32>
    %16 = arith.mulf %15, %12 : vector<1x640xf32>
    %cst_9 = arith.constant 0.00999999977 : f32
    %17 = vector.broadcast %cst_9 : f32 to vector<1x640xf32>
    %18 = arith.addf %17, %16 : vector<1x640xf32>
    %19 = arith.select %14, %18, %12 : vector<1x640xi1>, vector<1x640xf32>
    %c512_i32 = arith.constant 512 : i32
    %20 = vector.broadcast %c512_i32 : i32 to vector<1x640xi32>
    %21 = arith.cmpi slt, %7, %20 : vector<1x640xi32>
    %22 = arith.select %21, %19, %6 : vector<1x640xi1>, vector<1x640xf32>
    %c0_10 = arith.constant 0 : index
    %c0_11 = arith.constant 0 : index
    %23 = vector.load %arg4[%c0_10, %c0_11] : memref<1x640xf32, #tpu.memory_space<vmem>>, vector<1x640xf32>
    tpu.vector_store %arg4[%c0_10, %c0_11], %22 {strides = array<i32>} : memref<1x640xf32, #tpu.memory_space<vmem>>, vector<1x640xf32>,
    return
  }
  func.func @transform_0(%arg0: i32) -> (i32, i32) {
    %c0_i32 = arith.constant 0 : i32
    %c0_i32_0 = arith.constant 0 : i32
    return %arg0, %c0_i32 : i32, i32
  }
  func.func @transform_1(%arg0: i32) -> (i32, i32) {
    %c0_i32 = arith.constant 0 : i32
    %c0_i32_0 = arith.constant 0 : i32
    %c0_i32_1 = arith.constant 0 : i32
    return %c0_i32, %c0_i32_0 : i32, i32
  }
  func.func @transform_2(%arg0: i32) -> (i32, i32) {
    %c0_i32 = arith.constant 0 : i32
    %c0_i32_0 = arith.constant 0 : i32
    %c0_i32_1 = arith.constant 0 : i32
    return %c0_i32, %c0_i32_0 : i32, i32
  }
  func.func @transform_3(%arg0: i32) -> (i32, i32) {
    %c0_i32 = arith.constant 0 : i32
    %c0_i32_0 = arith.constant 0 : i32
    return %arg0, %c0_i32 : i32, i32
  }
}

</mosaic_0001>

<bundles_post_ra>
// kernel: policy_nn_canvas_2_forward_batched.1
= control target key start
LH: loop header
LB: loop body
LE: loop exit
PB: predicated region body
PF: predicated region fallthrough
CT: control target
= control target key end

     0   :  { %8 = vsyncpa [#allocation3], 0  ;;  %s1309_s0 = inlined_call_operand.vmem [shape: bf16[1,640], index: 0, kind: input, shape index: {}]   ;;  %s1310_s1 = inlined_call_operand.hbm [shape: bf16[640,128], index: 1, kind: input, shape index: {}]   ;;  %s1311_s2 = inlined_call_operand.hbm [shape: f32[128,640], index: 2, kind: input, shape index: {}]   ;;  %s1312_s3 = inlined_call_operand.vmem [shape: f32[1,640], index: 3, kind: output, shape index: {}]  }
   0x1   :  { %9 = vsyncpa [#allocation5], 0  ;;  %s1224_s12 = smov [#allocation2]  }
   0x2   :  { %s17_s13 = sshll.u32 %s1224_s12, 4  ;;  %s18_s13 = int_to_ptr.vmem [resolvable:$true] %s17_s13 }
   0x3   :  { %s1188_s14 = scalar_lea.vmem %s18_s13, 5120  ;;  %p1193_p1 = scmp.lt.s32.totalorder %s18_s13, %s18_s13 }
   0x4   :  { %p1189_p0 = scmp.ne.s32.totalorder %s18_s13, %s1188_s14  ;;  %p1194_p2 = scmp.lt.s32.totalorder %s1188_s14, %s1188_s14 }
   0x6   :  { %p1195_p3 = por %p1194_p2, %p1193_p1 }
   0x8   :  { %p1196_p4 = pnand %p1195_p3, %p1189_p0 }
   0xa   :  { %1199 = shalt.err (!%p1196_p4)
}
   0xb   :  { %s1225_s15 = smov 64   ;;  %s1226_s16 = smov 4  }
   0xc   :  { %23 = dma.hbm_to_vmem [thread:$0]  %s1310_s1, 5120, %s18_s13, [#allocation3], %s1225_s15, %s1225_s15, %s1226_s16  }
   0xd   :  { %s1227_s19 = smov [#allocation4]  }
   0xe   :  { %s29_s20 = sshll.u32 %s1227_s19, 4  ;;  %s30_s20 = int_to_ptr.vmem [resolvable:$true] %s29_s20 }
   0xf   :  { %s1208_s21 = scalar_lea.vmem %s30_s20, 10240  ;;  %p1213_p6 = scmp.lt.s32.totalorder %s30_s20, %s30_s20 }
  0x10   :  { %p1209_p5 = scmp.ne.s32.totalorder %s30_s20, %s1208_s21  ;;  %p1214_p7 = scmp.lt.s32.totalorder %s1208_s21, %s1208_s21 }
  0x12   :  { %p1215_p8 = por %p1214_p7, %p1213_p6 }
  0x14   :  { %p1216_p9 = pnand %p1215_p8, %p1209_p5 }
  0x16   :  { %1219 = shalt.err (!%p1216_p9)
}
  0x17   :  { %s1228_s22 = smov 640   ;;  %s1229_s23 = smov 40  }
  0x18   :  { %35 = dma.hbm_to_vmem [thread:$0]  %s1311_s2, 10240, %s30_s20, [#allocation5], %s1228_s22, %s1228_s22, %s1229_s23  }
  0x19   :  { %1220 = dma.done.wait [#allocation3], 5120  }
  0x1a   :  { %1221 = vsyncadd [#allocation3], 4294962176 }
  0x1b   :  { %1222 = dma.done.wait [#allocation5], 10240  }
  0x1c   :  { %1223 = vsyncadd [#allocation5], 4294957056  ;;  %v1123_v0 = vld [vmem:[#allocation2 + $0x78] sm:$0xff]   ;;  %v1127_v4 = vld [vmem:[#allocation2 + $0x70] sm:$0xff]   ;;  %v1230_v22 = vmov 1966171168   ;;  %v129_v24 = vlaneseq }
  0x1d   :  { %v1124_v1 = vld [vmem:[#allocation2 + $0xf8] sm:$0xff]   ;;  %989 = vmatprep.subr.bf16.mxu0 %v1123_v0  ;;  %v1128_v5 = vld [vmem:[#allocation2 + $0xf0] sm:$0xff]   ;;  %v1131_v8 = vld [vmem:[#allocation2 + $0x68] sm:$0xff]   ;;  %v127_v23 = vunpack.c.l.s4 %v1230_v22  ;;  %v1231_v40 = vmov 0.0   ;;  %vm1232_vm0 = vmmov 0  }
  0x1e   :  { %v1125_v2 = vld [vmem:[#allocation2 + $0x38] sm:$0xff]   ;;  %1011 = vmatprep.subr.bf16.mxu1 %v1124_v1  ;;  %v1129_v6 = vld [vmem:[#allocation2 + $0x30] sm:$0xff]   ;;  %v1132_v9 = vld [vmem:[#allocation2 + $0xe8] sm:$0xff]   ;;  %v130_v30 = vshrl.u32 %v129_v24, 7  ;;  %vm935_vm1 = vcmp.lt.s32.totalorder %v129_v24, 640 }
  0x1f   :  { %v1126_v3 = vld [vmem:[#allocation2 + $0xb8] sm:$0xff]   ;;  %990 = vmatpush3.bf16.msra.mxu0 %v1125_v2  ;;  %v1130_v7 = vld [vmem:[#allocation2 + $0xb0] sm:$0xff]   ;;  %v1133_v10 = vld [vmem:[#allocation2 + $0x28] sm:$0xff]   ;;  %v128_v29 = vunpack.c.0.s8 %v127_v23 }
  0x20   :  { %1012 = vmatpush3.bf16.msra.mxu1 %v1126_v3  ;;  %991 = vmatprep.subr.bf16.mxu0 %v1127_v4  ;;  %v1134_v11 = vld [vmem:[#allocation2 + $0xa8] sm:$0xff]   ;;  %v1135_v12 = vld [vmem:[#allocation2 + $0x60] sm:$0xff]   ;;  %v1139_v16 = vld [vmem:[#allocation2 + $0x58] sm:$0xff]  }
  0x21   :  { %1013 = vmatprep.subr.bf16.mxu1 %v1128_v5  ;;  %v1136_v13 = vld [vmem:[#allocation2 + $0xe0] sm:$0xff]   ;;  %v1140_v17 = vld [vmem:[#allocation2 + $0xd8] sm:$0xff]   ;;  %v1143_v20 = vld [vmem:[#allocation2 + $0x50] sm:$0xff]   ;;  %v1260_v35 = vsub.s32 %v128_v29, %v130_v30 }
  0x22   :  { %v1137_v14 = vld [vmem:[#allocation2 + $0x20] sm:$0xff]   ;;  %v1141_v18 = vld [vmem:[#allocation2 + $0x18] sm:$0xff]   ;;  %v1144_v21 = vld [vmem:[#allocation2 + $0xd0] sm:$0xff]  }
  0x23   :  { %992 = vmatpush3.bf16.msra.mxu0 %v1129_v6  ;;  %v1138_v15 = vld [vmem:[#allocation2 + $0xa0] sm:$0xff]   ;;  %v1142_v19 = vld [vmem:[#allocation2 + $0x98] sm:$0xff]   ;;  %v1145_v25 = vld [vmem:[#allocation2 + $0x10] sm:$0xff]  }
  0x24   :  { %1014 = vmatpush3.bf16.msra.mxu1 %v1130_v7  ;;  %993 = vmatprep.subr.bf16.mxu0 %v1131_v8  ;;  %v1146_v26 = vld [vmem:[#allocation2 + $0x90] sm:$0xff]   ;;  %v1147_v27 = vld [vmem:[#allocation2 + $0x48] sm:$0xff]   ;;  %v1151_v33 = vld [vmem:[#allocation2 + $0x40] sm:$0xff]  }
  0x25   :  { %1015 = vmatprep.subr.bf16.mxu1 %v1132_v9  ;;  %v1148_v28 = vld [vmem:[#allocation2 + $0xc8] sm:$0xff]   ;;  %v1152_v34 = vld [vmem:[#allocation2 + $0xc0] sm:$0xff]   ;;  %v1156_v44 = vld [vmem:[#allocation2 + $0x138] sm:$0xff]  }
  0x26   :  { %v1149_v31 = vld [vmem:[#allocation2 + $0x8] sm:$0xff]   ;;  %v1153_v36 = vld [vmem:[#allocation2] sm:$0xff]   ;;  %v1157_v47 = vld [vmem:[#allocation2 + $0x130] sm:$0xff]  }
  0x27   :  { %994 = vmatpush3.bf16.msra.mxu0 %v1133_v10  ;;  %v1150_v32 = vld [vmem:[#allocation2 + $0x88] sm:$0xff]   ;;  %v1154_v37 = vld [vmem:[#allocation2 + $0x80] sm:$0xff]   ;;  %v1160_v50 = vld [vmem:[#allocation2 + $0x118] sm:$0xff]  }
  0x28   :  { %1016 = vmatpush3.bf16.msra.mxu1 %v1134_v11  ;;  %995 = vmatprep.subr.bf16.mxu0 %v1135_v12  ;;  %v43_v38 = vld [vmem:[%s1309_s0] sm:$0x1f]  ;;  %v1158_v48 = vld [vmem:[#allocation2 + $0x128] sm:$0xff]   ;;  %v1161_v51 = vld [vmem:[#allocation2 + $0x110] sm:$0xff]  }
  0x29   :  { %1017 = vmatprep.subr.bf16.mxu1 %v1136_v13  ;;  %v132_v39 = vrot.slane %v43_v38, %v1260_v35  ;;  %v1159_v49 = vld [vmem:[#allocation2 + $0x120] sm:$0xff]   ;;  %v125_v52 = vcombine.high %v43_v38, %v43_v38  ;;  %v1162_v53 = vld [vmem:[#allocation2 + $0x108] sm:$0xff]   ;;  %v605_v58 = vld [vmem:[#allocation4 + $0x258] sm:$0xff] }
  0x2a   :  { %v1163_v55 = vld [vmem:[#allocation2 + $0x100] sm:$0xff]   ;;  %v608_v59 = vld [vmem:[#allocation4 + $0x270] sm:$0xff]  ;;  %v601_v60 = vld [vmem:[#allocation4 + $0x238] sm:$0xff] }
  0x2b   :  { %996 = vmatpush3.bf16.msra.mxu0 %v1137_v14  ;;  %v140_v41 = vcombine.high %v132_v39, %v132_v39  ;;  %v147_v42 = vrot.slane %v132_v39, %v1260_v35  ;;  %v139_v54 = vrot.slane %v125_v52, %v1260_v35  ;;  %v606_v57 = vld [vmem:[#allocation4 + $0x260] sm:$0xff]  ;;  %v607_v61 = vld [vmem:[#allocation4 + $0x268] sm:$0xff]  ;;  %v600_v62 = vld [vmem:[#allocation4 + $0x230] sm:$0xff] }
  0x2c   :  { %1018 = vmatpush3.bf16.msra.mxu1 %v1138_v15  ;;  %997 = vmatprep.subr.bf16.mxu0 %v1139_v16  ;;  %v603_v63 = vld [vmem:[#allocation4 + $0x248] sm:$0xff]  ;;  %v596_v0 = vld [vmem:[#allocation4 + $0x210] sm:$0xff]  ;;  %v602_v1 = vld [vmem:[#allocation4 + $0x240] sm:$0xff] }
  0x2d   :  { %1019 = vmatprep.subr.bf16.mxu1 %v1140_v17  ;;  %v161_v43 = vrot.slane %v140_v41, %v1260_v35  ;;  %v162_v45 = vcombine.high %v147_v42, %v147_v42  ;;  %v154_v56 = vrot.slane %v139_v54, %v1260_v35  ;;  %v595_v2 = vld [vmem:[#allocation4 + $0x208] sm:$0xff]  ;;  %v598_v3 = vld [vmem:[#allocation4 + $0x220] sm:$0xff]  ;;  %v597_v5 = vld [vmem:[#allocation4 + $0x218] sm:$0xff] }
  0x2e   :  { %v591_v4 = vld [vmem:[#allocation4 + $0x1e8] sm:$0xff]  ;;  %v593_v6 = vld [vmem:[#allocation4 + $0x1f8] sm:$0xff]  ;;  %v590_v7 = vld [vmem:[#allocation4 + $0x1e0] sm:$0xff] }
  0x2f   :  { %998 = vmatpush3.bf16.msra.mxu0 %v1141_v18  ;;  %441 = vmatprep.mubr.bf16.mxu0 %v161_v43  ;;  %v163_v46 = vcombine.high %v161_v43, %v161_v43  ;;  %v592_v8 = vld [vmem:[#allocation4 + $0x1f0] sm:$0xff]  ;;  %v586_v9 = vld [vmem:[#allocation4 + $0x1c0] sm:$0xff]  ;;  %v585_v11 = vld [vmem:[#allocation4 + $0x1b8] sm:$0xff] }
  0x30   :  { %1020 = vmatpush3.bf16.msra.mxu1 %v1142_v19  ;;  %999 = vmatprep.subr.bf16.mxu0 %v1143_v20  ;;  %v588_v10 = vld [vmem:[#allocation4 + $0x1d0] sm:$0xff]  ;;  %v587_v12 = vld [vmem:[#allocation4 + $0x1c8] sm:$0xff]  ;;  %v581_v13 = vld [vmem:[#allocation4 + $0x198] sm:$0xff] }
  0x31   :  { %1021 = vmatprep.subr.bf16.mxu1 %v1144_v21  ;;  %481 = vmatprep.mubr.bf16.mxu1 %v163_v46  ;;  %v583_v14 = vld [vmem:[#allocation4 + $0x1a8] sm:$0xff]  ;;  %v580_v15 = vld [vmem:[#allocation4 + $0x190] sm:$0xff]  ;;  %v582_v16 = vld [vmem:[#allocation4 + $0x1a0] sm:$0xff] }
  0x32   :  { %v576_v17 = vld [vmem:[#allocation4 + $0x170] sm:$0xff]  ;;  %v578_v18 = vld [vmem:[#allocation4 + $0x180] sm:$0xff]  ;;  %v575_v19 = vld [vmem:[#allocation4 + $0x168] sm:$0xff] }
  0x33   :  { %1000 = vmatpush3.bf16.msra.mxu0 %v1145_v25  ;;  %v577_v20 = vld [vmem:[#allocation4 + $0x178] sm:$0xff]  ;;  %v571_v21 = vld [vmem:[#allocation4 + $0x148] sm:$0xff]  ;;  %v570_v23 = vld [vmem:[#allocation4 + $0x140] sm:$0xff] }
  0x34   :  { %1022 = vmatpush3.bf16.msra.mxu1 %v1146_v26  ;;  %1001 = vmatprep.subr.bf16.mxu0 %v1147_v27  ;;  %v573_v22 = vld [vmem:[#allocation4 + $0x158] sm:$0xff]  ;;  %v572_v25 = vld [vmem:[#allocation4 + $0x150] sm:$0xff]  ;;  %v566_v26 = vld [vmem:[#allocation4 + $0x120] sm:$0xff] }
  0x35   :  { %1023 = vmatprep.subr.bf16.mxu1 %v1148_v28  ;;  %v568_v27 = vld [vmem:[#allocation4 + $0x130] sm:$0xff]  ;;  %v565_v28 = vld [vmem:[#allocation4 + $0x118] sm:$0xff]  ;;  %v567_v29 = vld [vmem:[#allocation4 + $0x128] sm:$0xff] }
  0x36   :  { %v561_v30 = vld [vmem:[#allocation4 + $0xf8] sm:$0xff]  ;;  %v551_v39 = vld [vmem:[#allocation4 + $0xa8] sm:$0xff]  ;;  %v552_v43 = vld [vmem:[#allocation4 + $0xb0] sm:$0xff] }
  0x37   :  { %1002 = vmatpush3.bf16.msra.mxu0 %v1149_v31  ;;  %v563_v31 = vld [vmem:[#allocation4 + $0x108] sm:$0xff]  ;;  %v557_v38 = vld [vmem:[#allocation4 + $0xd8] sm:$0xff]  ;;  %v542_v52 = vld [vmem:[#allocation4 + $0x60] sm:$0xff] }
  0x38   :  { %1024 = vmatpush3.bf16.msra.mxu1 %v1150_v32  ;;  %1003 = vmatprep.subr.bf16.mxu0 %v1151_v33  ;;  %v560_v32 = vld [vmem:[#allocation4 + $0xf0] sm:$0xff]  ;;  %v562_v33 = vld [vmem:[#allocation4 + $0x100] sm:$0xff]  ;;  %v553_v41 = vld [vmem:[#allocation4 + $0xb8] sm:$0xff] }
  0x39   :  { %1025 = vmatprep.subr.bf16.mxu1 %v1152_v34  ;;  %v556_v34 = vld [vmem:[#allocation4 + $0xd0] sm:$0xff]  ;;  %v545_v46 = vld [vmem:[#allocation4 + $0x78] sm:$0xff]  ;;  %v538_v54 = vld [vmem:[#allocation4 + $0x40] sm:$0xff] }
  0x3b   :  { %1004 = vmatpush3.bf16.msra.mxu0 %v1153_v36  ;;  %v558_v36 = vld [vmem:[#allocation4 + $0xe0] sm:$0xff] }
  0x3c   :  { %1026 = vmatpush3.bf16.msra.mxu1 %v1154_v37  ;;  %1059 = vmatprep.subr.bf16.mxu0 %v1231_v40  ;;  %v555_v37 = vld [vmem:[#allocation4 + $0xc8] sm:$0xff] }
  0x3d   :  { %610 = vmatprep.subr.mxu1 %v606_v57  ;;  %v530_v57 = vld [vmem:[#allocation4] sm:$0xff] }
  0x3e   :  { %442 = vmatmul.mubr.bf16.vlgmr.msra.gmra.mxu0 %v147_v42  ;;  %v550_v42 = vld [vmem:[#allocation4 + $0xa0] sm:$0xff] }
  0x3f   :  { %1060 = vmatpush3.bf16.msra.mxu0 %v1156_v44  ;;  %482 = vmatmul.mubr.bf16.vlgmr.msra.gmra.mxu1 %v162_v45  ;;  %v546_v44 = vld [vmem:[#allocation4 + $0x80] sm:$0xff]  ;;  %v548_v45 = vld [vmem:[#allocation4 + $0x90] sm:$0xff] }
  0x40   :  { %1061 = vmatprep.subr.bf16.mxu0 %v1231_v40  ;;  %1075 = vmatprep.mubr.msk.bf16.mxu0 %vm1232_vm0, %v1231_v40 }
  0x41   :  { %674 = vmatprep.mubr.f32.mxu1 %v1231_v40  ;;  %611 = vmatpush1.msra.mxu1 %v605_v58  ;;  %v533_v58 = vld [vmem:[#allocation4 + $0x18] sm:$0xff] }
  0x42   :  { %612 = vmatprep.subr.mxu1 %v601_v60 }
  0x43   :  { %1062 = vmatpush3.bf16.msra.mxu0 %v1157_v47  ;;  %613 = vmatpush1.msra.mxu1 %v600_v62  ;;  %v547_v47 = vld [vmem:[#allocation4 + $0x88] sm:$0xff] }
  0x44   :  { %1063 = vmatprep.subr.bf16.mxu0 %v1231_v40  ;;  %614 = vmatprep.subr.mxu1 %v596_v0 }
  0x45   :  { %615 = vmatpush1.msra.mxu1 %v595_v2 }
  0x46   :  { %616 = vmatprep.subr.mxu1 %v591_v4 }
  0x47   :  { %1064 = vmatpush3.bf16.msra.mxu0 %v1158_v48  ;;  %617 = vmatpush1.msra.mxu1 %v590_v7  ;;  %v541_v48 = vld [vmem:[#allocation4 + $0x58] sm:$0xff] }
  0x48   :  { %1065 = vmatprep.subr.bf16.mxu0 %v1231_v40  ;;  %618 = vmatprep.subr.mxu1 %v586_v9 }
  0x49   :  { %619 = vmatpush1.msra.mxu1 %v585_v11  ;;  %v609_v11 = vld [vmem:[#allocation4 + $0x278] sm:$0xff] }
  0x4a   :  { %620 = vmatprep.subr.mxu1 %v581_v13  ;;  %v604_v13 = vld [vmem:[#allocation4 + $0x250] sm:$0xff] }
  0x4b   :  { %1066 = vmatpush3.bf16.msra.mxu0 %v1159_v49  ;;  %621 = vmatpush1.msra.mxu1 %v580_v15  ;;  %v543_v49 = vld [vmem:[#allocation4 + $0x68] sm:$0xff] }
  0x4c   :  { %1067 = vmatprep.subr.bf16.mxu0 %v1231_v40  ;;  %622 = vmatprep.subr.mxu1 %v576_v17  ;;  %v599_v15 = vld [vmem:[#allocation4 + $0x228] sm:$0xff]  ;;  %v589_v17 = vld [vmem:[#allocation4 + $0x1d8] sm:$0xff] }
  0x4d   :  { %623 = vmatpush1.msra.mxu1 %v575_v19  ;;  %v579_v19 = vld [vmem:[#allocation4 + $0x188] sm:$0xff] }
  0x4e   :  { %624 = vmatprep.subr.mxu1 %v571_v21  ;;  %v569_v21 = vld [vmem:[#allocation4 + $0x138] sm:$0xff] }
  0x4f   :  { %1068 = vmatpush3.bf16.msra.mxu0 %v1160_v50  ;;  %625 = vmatpush1.msra.mxu1 %v570_v23  ;;  %v540_v50 = vld [vmem:[#allocation4 + $0x50] sm:$0xff]  ;;  %v559_v23 = vld [vmem:[#allocation4 + $0xe8] sm:$0xff] }
  0x50   :  { %1069 = vmatprep.subr.bf16.mxu0 %v1231_v40  ;;  %626 = vmatprep.subr.mxu1 %v566_v26  ;;  %v549_v26 = vld [vmem:[#allocation4 + $0x98] sm:$0xff] }
  0x51   :  { %627 = vmatpush1.msra.mxu1 %v565_v28  ;;  %v539_v28 = vld [vmem:[#allocation4 + $0x48] sm:$0xff] }
  0x52   :  { %628 = vmatprep.subr.mxu1 %v561_v30 }
  0x53   :  { %1070 = vmatpush3.bf16.msra.mxu0 %v1161_v51  ;;  %629 = vmatpush1.msra.mxu1 %v560_v32  ;;  %v536_v51 = vld [vmem:[#allocation4 + $0x30] sm:$0xff] }
  0x54   :  { %1071 = vmatprep.subr.bf16.mxu0 %v1231_v40  ;;  %630 = vmatprep.subr.mxu1 %v556_v34 }
  0x55   :  { %631 = vmatpush1.msra.mxu1 %v555_v37 }
  0x56   :  { %632 = vmatprep.subr.mxu1 %v551_v39 }
  0x57   :  { %1072 = vmatpush3.bf16.msra.mxu0 %v1162_v53  ;;  %633 = vmatpush1.msra.mxu1 %v550_v42  ;;  %v535_v53 = vld [vmem:[#allocation4 + $0x28] sm:$0xff] }
  0x58   :  { %1073 = vmatprep.subr.bf16.mxu0 %v1231_v40  ;;  %634 = vmatprep.subr.mxu1 %v546_v44 }
  0x59   :  { %635 = vmatpush1.msra.mxu1 %v545_v46 }
  0x5a   :  { %636 = vmatprep.subr.mxu1 %v541_v48 }
  0x5b   :  { %1074 = vmatpush3.bf16.msra.mxu0 %v1163_v55  ;;  %637 = vmatpush1.msra.mxu1 %v540_v50  ;;  %v531_v55 = vld [vmem:[#allocation4 + $0x8] sm:$0xff] }
  0x5c   :  { %681 = vmatprep.subr.mxu0 %v608_v59  ;;  %638 = vmatprep.subr.mxu1 %v536_v51  ;;  %v532_v59 = vld [vmem:[#allocation4 + $0x10] sm:$0xff] }
  0x5d   :  { %639 = vmatpush1.msra.mxu1 %v535_v53 }
  0x5e   :  { %1076 = vmatmul.mubr.bf16.vlgmr.msra.gmra.mxu0 %v154_v56  ;;  %v537_v56 = vld [vmem:[#allocation4 + $0x38] sm:$0xff]  ;;  %640 = vmatprep.subr.mxu1 %v531_v55 }
  0x5f   :  { %745 = vmatprep.mubr.f32.mxu0 %v1231_v40  ;;  %682 = vmatpush1.msra.mxu0 %v607_v61 }
  0x60   :  { %683 = vmatprep.subr.mxu0 %v603_v63  ;;  %641 = vmatpush1.msra.mxu1 %v530_v57 }
  0x61   :  { %684 = vmatpush1.msra.mxu0 %v602_v1  ;;  %1079 = vmatprep.subr.mxu1 %v1231_v40 }
  0x62   :  { %685 = vmatprep.subr.mxu0 %v598_v3 }
  0x63   :  { %686 = vmatpush1.msra.mxu0 %v597_v5 }
  0x64   :  { %687 = vmatprep.subr.mxu0 %v593_v6 }
  0x65   :  { %688 = vmatpush1.msra.mxu0 %v592_v8 }
  0x66   :  { %689 = vmatprep.subr.mxu0 %v588_v10 }
  0x67   :  { %690 = vmatpush1.msra.mxu0 %v587_v12 }
  0x68   :  { %691 = vmatprep.subr.mxu0 %v583_v14 }
  0x69   :  { %692 = vmatpush1.msra.mxu0 %v582_v16  ;;  %v594_v16 = vld [vmem:[#allocation4 + $0x200] sm:$0xff] }
  0x6a   :  { %693 = vmatprep.subr.mxu0 %v578_v18  ;;  %v584_v18 = vld [vmem:[#allocation4 + $0x1b0] sm:$0xff] }
  0x6b   :  { %694 = vmatpush1.msra.mxu0 %v577_v20  ;;  %v574_v20 = vld [vmem:[#allocation4 + $0x160] sm:$0xff] }
  0x6c   :  { %695 = vmatprep.subr.mxu0 %v573_v22  ;;  %v564_v22 = vld [vmem:[#allocation4 + $0x110] sm:$0xff] }
  0x6d   :  { %696 = vmatpush1.msra.mxu0 %v572_v25  ;;  %v554_v25 = vld [vmem:[#allocation4 + $0xc0] sm:$0xff] }
  0x6e   :  { %697 = vmatprep.subr.mxu0 %v568_v27  ;;  %v544_v27 = vld [vmem:[#allocation4 + $0x70] sm:$0xff] }
  0x6f   :  { %698 = vmatpush1.msra.mxu0 %v567_v29  ;;  %v534_v29 = vld [vmem:[#allocation4 + $0x20] sm:$0xff] }
  0x70   :  { %699 = vmatprep.subr.mxu0 %v563_v31 }
  0x71   :  { %700 = vmatpush1.msra.mxu0 %v562_v33 }
  0x72   :  { %701 = vmatprep.subr.mxu0 %v558_v36 }
  0x73   :  { %702 = vmatpush1.msra.mxu0 %v557_v38 }
  0x74   :  { %703 = vmatprep.subr.mxu0 %v553_v41 }
  0x75   :  { %704 = vmatpush1.msra.mxu0 %v552_v43 }
  0x76   :  { %705 = vmatprep.subr.mxu0 %v548_v45 }
  0x77   :  { %706 = vmatpush1.msra.mxu0 %v547_v47 }
  0x78   :  { %707 = vmatprep.subr.mxu0 %v543_v49 }
  0x79   :  { %708 = vmatpush1.msra.mxu0 %v542_v52 }
  0x7a   :  { %709 = vmatprep.subr.mxu0 %v538_v54 }
  0x7b   :  { %710 = vmatpush1.msra.mxu0 %v537_v56 }
  0x7c   :  { %711 = vmatprep.subr.mxu0 %v533_v58 }
  0x7d   :  { %712 = vmatpush1.msra.mxu0 %v532_v59 }
  0xfe   :  { %v1005_v60 = vpop.f32.mrf.mxu0 }
  0xff   :  { %v1027_v61 = vpop.f32.mrf.mxu1 }
 0x100   :  { %v1006_v62 = vpop.f32.mrf.mxu0 }
 0x101   :  { %v1028_v63 = vpop.f32.mrf.mxu1  ;;  %v1007_v4 = vadd.f32 %v1006_v62, %v1005_v60 }
 0x102   :  { %v1008_v0 = vpop.f32.mrf.mxu0  ;;  %v1029_v5 = vadd.f32 %v1028_v63, %v1027_v61 }
 0x103   :  { %v1030_v2 = vpop.f32.mrf.mxu1 }
 0x104   :  { %v1009_v1 = vpop.f32.mrf.mxu0  ;;  %v484_v6 = vadd.f32 %v1029_v5, %v1007_v4 }
 0x105   :  { %v1031_v3 = vpop.f32.mrf.mxu1 }
 0x11e   :  { %v523_v7 = vpop.f32.mrf.mxu0 }
 0x11f   :  { %v524_v8 = vadd.f32 %v523_v7, %v484_v6 }
 0x120   :  { %v1077_v9 = vpop.f32.mrf.mxu0 }
 0x121   :  { %v529_v10 = vmax.f32 %v524_v8, 0.0 }
 0x122   :  { %v526_v12 = vpop.f32.mrf.mxu0 }
 0x123   :  { %675 = vmatmul.mubr.f32.vlgmr.msra.gmra.mxu1 %v529_v10  ;;  %746 = vmatmul.mubr.f32.vlgmr.msra.gmra.mxu0 %v529_v10 }
 0x124   :  { %1080 = vmatpush3.msra.mxu1 %v609_v11  ;;  %v1078_v14 = vpop.f32.mrf.mxu0  ;;  %1111 = vmatprep.mubr.msk.f32.mxu1 %vm1232_vm0, %v1231_v40 }
 0x125   :  { %1081 = vmatprep.subr.mxu1 %v1231_v40 }
 0x126   :  { %1082 = vmatpush3.msra.mxu1 %v604_v13 }
 0x127   :  { %1083 = vmatprep.subr.mxu1 %v1231_v40 }
 0x128   :  { %1084 = vmatpush3.msra.mxu1 %v599_v15 }
 0x129   :  { %1085 = vmatprep.subr.mxu1 %v1231_v40 }
 0x12a   :  { %1086 = vmatpush3.msra.mxu1 %v594_v16 }
 0x12b   :  { %1087 = vmatprep.subr.mxu1 %v1231_v40 }
 0x12c   :  { %1088 = vmatpush3.msra.mxu1 %v589_v17 }
 0x12d   :  { %1089 = vmatprep.subr.mxu1 %v1231_v40 }
 0x12e   :  { %1090 = vmatpush3.msra.mxu1 %v584_v18 }
 0x12f   :  { %1091 = vmatprep.subr.mxu1 %v1231_v40 }
 0x130   :  { %1092 = vmatpush3.msra.mxu1 %v579_v19 }
 0x131   :  { %1093 = vmatprep.subr.mxu1 %v1231_v40 }
 0x132   :  { %1094 = vmatpush3.msra.mxu1 %v574_v20 }
 0x133   :  { %1095 = vmatprep.subr.mxu1 %v1231_v40 }
 0x134   :  { %1096 = vmatpush3.msra.mxu1 %v569_v21 }
 0x135   :  { %1097 = vmatprep.subr.mxu1 %v1231_v40 }
 0x136   :  { %1098 = vmatpush3.msra.mxu1 %v564_v22 }
 0x137   :  { %1099 = vmatprep.subr.mxu1 %v1231_v40 }
 0x138   :  { %1100 = vmatpush3.msra.mxu1 %v559_v23 }
 0x139   :  { %1101 = vmatprep.subr.mxu1 %v1231_v40 }
 0x13a   :  { %1102 = vmatpush3.msra.mxu1 %v554_v25 }
 0x13b   :  { %1103 = vmatprep.subr.mxu1 %v1231_v40 }
 0x13c   :  { %1104 = vmatpush3.msra.mxu1 %v549_v26 }
 0x13d   :  { %1105 = vmatprep.subr.mxu1 %v1231_v40 }
 0x13e   :  { %1106 = vmatpush3.msra.mxu1 %v544_v27 }
 0x13f   :  { %1107 = vmatprep.subr.mxu1 %v1231_v40 }
 0x140   :  { %1108 = vmatpush3.msra.mxu1 %v539_v28 }
 0x141   :  { %1109 = vmatprep.subr.mxu1 %v1231_v40 }
 0x142   :  { %1110 = vmatpush3.msra.mxu1 %v534_v29 }
 0x143   :  { %1112 = vmatmul.mubr.f32.vlgmr.msra.gmra.mxu1 %v529_v10 }
 0x1e3   :  { %v676_v30 = vpop.f32.mrf.mxu1  ;;  %v747_v31 = vpop.f32.mrf.mxu0 }
 0x1e4   :  { %v984_v32 = vmul.f32 -1.442695, %v676_v30  ;;  %v986_v33 = vmul.f32 -1.442695, %v747_v31 }
 0x1e5   :  { %v678_v34 = vpop.f32.mrf.mxu1  ;;  %v749_v36 = vpop.f32.mrf.mxu0 }
 0x1e6   :  { %1164 = vpow2.f32 %v984_v32  ;;  %v985_v37 = vmul.f32 -1.442695, %v678_v34  ;;  %v987_v38 = vmul.f32 -1.442695, %v749_v36 }
 0x1e7   :  { %1166 = vpow2.f32 %v986_v33 }
 0x1e8   :  { %1168 = vpow2.f32 %v985_v37 }
 0x1e9   :  { %1170 = vpow2.f32 %v987_v38 }
 0x1f3   :  { %v1165_v39 = vpop.eup %1164 }
 0x1f4   :  { %v1167_v41 = vpop.eup %1166  ;;  %v843_v42 = vadd.f32 1.0, %v1165_v39 }
 0x1f5   :  { %v1169_v43 = vpop.eup %1168  ;;  %v845_v40 = vadd.f32 1.0, %v1167_v41 }
 0x1f6   :  { %v1171_v44 = vpop.eup %1170  ;;  %1172 = vrcp.f32 %v843_v42  ;;  %v844_v45 = vadd.f32 1.0, %v1169_v43 }
 0x1f7   :  { %v846_v46 = vadd.f32 1.0, %v1171_v44 }
 0x1f8   :  { %1174 = vrcp.f32 %v844_v45 }
 0x1f9   :  { %1176 = vrcp.f32 %v846_v46 }
 0x1fa   :  { %1178 = vrcp.f32 %v845_v40 }
 0x203   :  { %v1173_v47 = vpop.eup %1172  ;;  %v818_v48 = vpop.f32.mrf.mxu1 }
 0x204   :  { %v863_v49 = vmul.f32 0.98, %v1173_v47  ;;  %v915_v61 = vrot.slane %v818_v48, %v1260_v35 }
 0x205   :  { %v1175_v50 = vpop.eup %1174  ;;  %v1113_v51 = vpop.f32.mrf.mxu1 }
 0x206   :  { %v1177_v52 = vpop.eup %1176  ;;  %v864_v53 = vmul.f32 0.98, %v1175_v50  ;;  %v868_v55 = vadd.f32 0.01, %v863_v49  ;;  %v930_v0 = vrot.slane %v915_v61, %v1260_v35 }
 0x207   :  { %v1179_v54 = vpop.eup %1178 }
 0x208   :  { %v869_v56 = vadd.f32 0.01, %v864_v53  ;;  %v894_v57 = vcombine.low %v1179_v54, %v1177_v52 }
 0x20a   :  { %v893_v58 = vcombine.low %v868_v55, %v869_v56  ;;  %v908_v60 = vrot.slane %v894_v57, %v1260_v35 }
 0x20c   :  { %v901_v59 = vrot.slane %v893_v58, %v1260_v35 }
 0x20e   :  { %v916_v62 = vcombine.low %v901_v59, %v908_v60 }
 0x210   :  { %v923_v63 = vrot.slane %v916_v62, %v1260_v35 }
 0x212   :  { %v931_v1 = vcombine.low %v923_v63, %v930_v0 }
 0x214   :  { %937 = vst.msk [vmem:[%s1312_s3] sm:$0x1f] %vm935_vm1, %v931_v1 }
 0x215   :  { %942 = vsyncpa [#allocation3], 1 }
 0x216   :  { %943 = vsyncpa [#allocation5], 1 }

</bundles_post_ra>
